<compile_context>
chip_gen: v5e
topology: v5e:2x2
jax: 0.10.0
libtpu: 0.0.40
codegen_flags: <defaults>
</compile_context>

<pallas_src>
import functools

import jax
import jax.numpy as jnp
from jax import lax
from jax.experimental import pallas as pl
from jax.experimental.pallas import tpu as pltpu


def _unca_kernel(x_ref, dwb_ref, w_ref, b2_ref, amask_ref, out_ref, *,
                 C: int, alive_ch: int):
    N, H, WC = x_ref.shape
    NH = N * H
    num_steps = amask_ref.shape[0]
    neg = jnp.float32(-jnp.inf)

    # ---- step-invariant values (hoisted; computed once per invocation) -----
    d1 = dwb_ref[0]                      # (1, WC) packed depthwise-conv biases
    d2 = dwb_ref[1]
    d3 = dwb_ref[2]
    b2 = b2_ref[...]                     # (1, WC) packed 1x1-conv bias

    lane = lax.broadcasted_iota(jnp.int32, (NH, WC), 1)
    row = lax.broadcasted_iota(jnp.int32, (NH, WC), 0) % H   # row within image
    has_wl = lane >= C                   # pixel has a w-1 neighbour (pool is non-circular)
    has_wr = lane < WC - C
    has_hu = row >= 1
    has_hd = row <= H - 2
    alive_lane = (lane % C) == alive_ch

    def wroll(a, pix):
        # circular shift by `pix` pixels along W == lane rotation by pix*C
        return pltpu.roll(a, (pix * C) % WC, axis=1)

    def hroll(a, rows):
        # circular shift along H, per image (rows never wrap across images)
        return jnp.roll(a.reshape(N, H, WC), rows, axis=1).reshape(NH, WC)

    def step(t, x):
        # ---- depthwise 3x3 circular convs (frozen stencils / 8), separable.
        #   k1/8 = (outer([1,2,1],[1,2,1]) - 16*delta)/8
        #   k2/8 =  outer([1,2,1],[-1,0,1])/8   (Sobel x)
        #   k3/8 =  outer([-1,0,1],[1,2,1])/8   (Sobel y)
        up, dn = hroll(x, 1), hroll(x, -1)            # x[h-1], x[h+1]
        cs = up + 2.0 * x + dn                        # vertical [1, 2, 1]
        cd = dn - up                                  # vertical [-1, 0, 1]
        cs_l, cs_r = wroll(cs, 1), wroll(cs, -1)      # cs[w-1], cs[w+1]
        cd_l, cd_r = wroll(cd, 1), wroll(cd, -1)
        s1 = (cs_l + 2.0 * cs + cs_r - 16.0 * x) * 0.125 + d1
        s2 = (cs_r - cs_l) * 0.125 + d2
        s3 = (cd_l + 2.0 * cd + cd_r) * 0.125 + d3

        # ---- 1x1 conv (8C -> C): ONE bf16 MXU matmul against the merged
        # block-diagonal weight (segment order matches the torch concat).
        lhs = jnp.concatenate(
            [x, s1, s2, s3, jnp.abs(x), jnp.abs(s1), jnp.abs(s2), jnp.abs(s3)],
            axis=1).astype(w_ref.dtype)                        # (NH, 8*WC)
        y = jnp.dot(lhs, w_ref[...],
                    preferred_element_type=jnp.float32) + b2   # (NH, WC) f32

        # ---- life mask: separable 3x3 max-pool (stride 1, -inf borders) of
        # the packed pre-update state, then broadcast the alive channel over
        # its C-lane pixel group with a pre-rotation + log-tree of lane rolls.
        wl = jnp.where(has_wl, wroll(x, 1), neg)
        wr = jnp.where(has_wr, wroll(x, -1), neg)
        m1 = jnp.maximum(jnp.maximum(wl, x), wr)
        hu = jnp.where(has_hu, hroll(m1, 1), neg)
        hd = jnp.where(has_hd, hroll(m1, -1), neg)
        pooled = jnp.maximum(jnp.maximum(hu, m1), hd)

        b = pltpu.roll(jnp.where(alive_lane, pooled, neg),
                       (WC - alive_ch) % WC, axis=1)   # alive value -> lane w*C
        sh = 1
        while sh < C:                                  # C is a power of two
            b = jnp.maximum(b, pltpu.roll(b, sh, axis=1))
            sh *= 2

        # ---- update: pre_life_mask == post_life_mask (both pooled from the
        # pre-update grid), fused into a single select (no f32 mask + mul).
        return jnp.where(b > 0.1, x + y * amask_ref[t], 0.0)

    x0 = x_ref[...].reshape(NH, WC)
    xf = lax.fori_loop(0, num_steps, step, x0)
    out_ref[...] = xf.reshape(N, H, WC)


def prepare_params(params, H, W, *, weight_dtype=jnp.bfloat16):
    """Pack parameters into the kernel-native lane-dense layout (done once).

    params = (dwb, w2, b2):
      dwb: (3, C)   biases of the three frozen depthwise 3x3 convs
      w2 : (C, 8C)  1x1 conv weight, input order [x,s1,s2,s3,|x|,|s1|,|s2|,|s3|]
      b2 : (C,)     1x1 conv bias
    """
    dwb, w2, b2 = params
    C = dwb.shape[1]
    WC = W * C
    dwb_packed = jnp.tile(dwb.astype(jnp.float32), (1, W)).reshape(3, 1, WC)
    b2_packed = jnp.tile(b2.reshape(1, C).astype(jnp.float32), (1, W))       # (1, WC)
    # Merged block-diagonal 1x1-conv weight:
    #   w_merged[s*WC + u*C + j, w*C + c] = w2[c, s*C + j] if u == w else 0
    # NOTE: this is 8*(W*C)^2 elements (quadratic in W*C); at large H/W keep it
    # bf16, tile the 1x1 conv over W blocks, or stream it from HBM manually.
    blocks = w2.astype(jnp.float32).reshape(C, 8, C).transpose(1, 2, 0)      # (s, j, c)
    eye_w = jnp.eye(W, dtype=jnp.float32)
    w_merged = jnp.einsum("uw,sjc->sujwc", eye_w, blocks).reshape(8 * WC, WC)
    return dwb_packed, w_merged.astype(weight_dtype), b2_packed


def unca_rollout_packed(x_packed, prepared, amask_packed, *, C, alive_ch=3,
                        interpret=False):
    """Run amask_packed.shape[0] fused NCA steps in one pallas_call.

    x_packed:     (N, H, W*C)            float32 (lane-dense packed state)
    amask_packed: (num_steps, N*H, W*C)  float32 per-step async update masks
    """
    N, H, WC = x_packed.shape
    dwb_packed, w_merged, b2_packed = prepared
    kernel = functools.partial(_unca_kernel, C=C, alive_ch=alive_ch)
    vmem = pl.BlockSpec(memory_space=pltpu.MemorySpace.VMEM)
    return pl.pallas_call(
        kernel,
        out_shape=jax.ShapeDtypeStruct((N, H, WC), jnp.float32),
        in_specs=[vmem, vmem, vmem, vmem, vmem],
        out_specs=vmem,
        interpret=interpret,
    )(x_packed, dwb_packed, w_merged, b2_packed, amask_packed)


# ---------------------------- NCHW wrappers ----------------------------------
def pack_nchw(x_nchw):
    N, C, H, W = x_nchw.shape
    return jnp.transpose(x_nchw, (0, 2, 3, 1)).reshape(N, H, W * C).astype(jnp.float32)


def unpack_to_nchw(x_packed, C):
    N, H, WC = x_packed.shape
    return jnp.transpose(x_packed.reshape(N, H, WC // C, C), (0, 3, 1, 2))


def pack_amask(amask_schw, N):
    # (steps, C, H, W) -> (steps, N*H, W*C), replicated over the folded batch.
    S, C, H, W = amask_schw.shape
    a = jnp.transpose(amask_schw, (0, 2, 3, 1)).reshape(S, 1, H, W * C)
    return jnp.broadcast_to(a, (S, N, H, W * C)).reshape(S, N * H, W * C).astype(jnp.float32)


def unca_forward(x_nchw, params, async_mask_chw):
    """Single forward step (torch `visualize`) with the NCHW interface."""
    N, C, H, W = x_nchw.shape
    assert C >= 4 and (C & (C - 1)) == 0, "channel count must be a power of two >= 4"
    prepared = prepare_params(params, H, W)
    amask = pack_amask(async_mask_chw[None], N)
    out = unca_rollout_packed(pack_nchw(x_nchw), prepared, amask, C=C)
    return unpack_to_nchw(out, C)


def unca_rollout(x_nchw, params, async_masks_schw):
    """Multi-step rollout (torch `__call__`): all steps fused in one kernel.
    clip_grad_norm_ in the reference is a training-time no-op for forward values."""
    N, C, H, W = x_nchw.shape
    assert C >= 4 and (C & (C - 1)) == 0
    prepared = prepare_params(params, H, W)
    amask = pack_amask(async_masks_schw, N)
    out = unca_rollout_packed(pack_nchw(x_nchw), prepared, amask, C=C)
    return unpack_to_nchw(out, C)


def init_params(key, out_features):
    """Runtime parameters (the 3x3 stencils are frozen constants in the module)."""
    C = out_features
    kb, kw2, kb2 = jax.random.split(key, 3)
    # torch Conv2d default bias init: U(-1/sqrt(fan_in), 1/sqrt(fan_in)).
    dwb = jax.random.uniform(kb, (3, C), jnp.float32, -1.0 / 3.0, 1.0 / 3.0)  # fan_in=9
    bound = 1.0 / float((8.0 * C) ** 0.5)
    w2 = jax.random.uniform(kw2, (C, 8 * C), jnp.float32, -bound, bound)
    b2 = jax.random.uniform(kb2, (C,), jnp.float32, -bound, bound)
    return dwb, w2, b2


# ----------------------- pure-JAX reference (validation) ---------------------
def unca_reference_nchw(x, params, amasks_schw):
    """Mirror of the PyTorch forward.  The 1x1-conv inputs are cast to bf16
    (like the kernel's MXU path) so only accumulation-order noise remains."""
    dwb, w2, b2 = params
    k1 = jnp.array([[1., 2., 1.], [2., -12., 2.], [1., 2., 1.]], jnp.float32) / 8.0
    k2 = jnp.array([[-1., 0., 1.], [-2., 0., 2.], [-1., 0., 1.]], jnp.float32) / 8.0
    k3 = jnp.array([[-1., -2., -1.], [0., 0., 0.], [1., 2., 1.]], jnp.float32) / 8.0

    def dwconv(a, k, b):      # circular cross-correlation per channel + bias
        out = jnp.zeros_like(a)
        for i in range(3):
            for j in range(3):
                out = out + k[i, j] * jnp.roll(a, (-(i - 1), -(j - 1)), axis=(2, 3))
        return out + b[None, :, None, None]

    def max_pool3(a):         # 3x3 / stride-1 max pool with -inf border, a: (N, H, W)
        p = jnp.pad(a, ((0, 0), (1, 1), (1, 1)), constant_values=-jnp.inf)
        Hh, Ww = a.shape[1], a.shape[2]
        return jnp.max(jnp.stack([p[:, i:i + Hh, j:j + Ww]
                                  for i in range(3) for j in range(3)]), axis=0)

    for t in range(amasks_schw.shape[0]):
        s1 = dwconv(x, k1, dwb[0])
        s2 = dwconv(x, k2, dwb[1])
        s3 = dwconv(x, k3, dwb[2])
        y8 = jnp.concatenate([x, s1, s2, s3,
                              jnp.abs(x), jnp.abs(s1), jnp.abs(s2), jnp.abs(s3)], axis=1)
        n, c8, hh, ww = y8.shape
        lhs = jnp.transpose(y8, (0, 2, 3, 1)).reshape(-1, c8).astype(jnp.bfloat16)
        y = jnp.dot(lhs, w2.T.astype(jnp.bfloat16), preferred_element_type=jnp.float32)
        y = jnp.transpose(y.reshape(n, hh, ww, -1), (0, 3, 1, 2)) + b2[None, :, None, None]
        alive = max_pool3(x[:, 3]) > 0.1          # pre == post (both on pre-update x)
        x = jnp.where(alive[:, None], x + y * amasks_schw[t][None], 0.0)
    return x


if __name__ == "__main__":
    key = jax.random.PRNGKey(0)
    N, C, H, W = 2, 8, 16, 16     # C = out_features; channel 3 is the "alive" channel
    kx, kp, km = jax.random.split(key, 3)

    x = jax.random.normal(kx, (N, C, H, W), jnp.float32)
    params = init_params(kp, C)
    # torch.rand((C, H, W)) > 0.5 equivalent, drawn host-side.
    # TODO(synk): the async mask could be drawn in-kernel via pltpu.prng_* if
    # bit-parity with torch.rand's host RNG stream is not required.
    amask1 = (jax.random.uniform(km, (C, H, W)) > 0.5).astype(jnp.float32)

    # Single step (torch `visualize`).
    out = jax.block_until_ready(jax.jit(unca_forward)(x, params, amask1))
    assert out.shape == (N, C, H, W) and out.dtype == jnp.float32

    # Validate against the pure-JAX reference (bf16 matmul path in both).
    ref = unca_reference_nchw(x, params, amask1[None])
    err = float(jnp.max(jnp.abs(out - ref)))
    assert err < 2e-2, f"kernel/reference mismatch: max|diff|={err}"

    # Fused 3-step rollout (weights + state stay resident for all steps).
    km2 = jax.random.fold_in(km, 1)
    amask3 = (jax.random.uniform(km2, (3, C, H, W)) > 0.5).astype(jnp.float32)
    out3 = jax.block_until_ready(jax.jit(unca_rollout)(x, params, amask3))
    assert out3.shape == (N, C, H, W) and bool(jnp.all(jnp.isfinite(out3)))

    print("KERNEL_OK")
</pallas_src>

<mosaic_0001>
module attributes {stable_mosaic.version = 11 : i64} {
  func.func @_unca_kernel(%arg0: memref<2x16x128xf32, #tpu.memory_space<vmem>>, %arg1: memref<3x1x128xf32, #tpu.memory_space<vmem>>, %arg2: memref<1024x128xbf16, #tpu.memory_space<vmem>>, %arg3: memref<1x128xf32, #tpu.memory_space<vmem>>, %arg4: memref<1x32x128xf32, #tpu.memory_space<vmem>>, %arg5: memref<2x16x128xf32, #tpu.memory_space<vmem>>) attributes {dimension_semantics = [], scalar_prefetch = 0 : i64, scratch_operands = 0 : i64, tpu.core_type = #tpu.core_type<tc>} {
    %c0 = arith.constant 0 : index
    %c0_0 = arith.constant 0 : index
    %c0_1 = arith.constant 0 : index
    %0 = vector.load %arg1[%c0, %c0_0, %c0_1] : memref<3x1x128xf32, #tpu.memory_space<vmem>>, vector<1x1x128xf32>
    %1 = vector.shape_cast %0 : vector<1x1x128xf32> to vector<1x128xf32>
    %c1 = arith.constant 1 : index
    %c0_2 = arith.constant 0 : index
    %c0_3 = arith.constant 0 : index
    %2 = vector.load %arg1[%c1, %c0_2, %c0_3] : memref<3x1x128xf32, #tpu.memory_space<vmem>>, vector<1x1x128xf32>
    %3 = vector.shape_cast %2 : vector<1x1x128xf32> to vector<1x128xf32>
    %c2 = arith.constant 2 : index
    %c0_4 = arith.constant 0 : index
    %c0_5 = arith.constant 0 : index
    %4 = vector.load %arg1[%c2, %c0_4, %c0_5] : memref<3x1x128xf32, #tpu.memory_space<vmem>>, vector<1x1x128xf32>
    %5 = vector.shape_cast %4 : vector<1x1x128xf32> to vector<1x128xf32>
    %c0_6 = arith.constant 0 : index
    %c0_7 = arith.constant 0 : index
    %6 = vector.load %arg3[%c0_6, %c0_7] : memref<1x128xf32, #tpu.memory_space<vmem>>, vector<1x128xf32>
    %7 = tpu.iota {dimensions = array<i32: 1>} : vector<32x128xi32>
    %8 = tpu.iota {dimensions = array<i32: 0>} : vector<32x128xi32>
    %c16_i32 = arith.constant 16 : i32
    %c0_i32 = arith.constant 0 : i32
    %9 = arith.cmpi eq, %c16_i32, %c0_i32 : i32
    %c1_i32 = arith.constant 1 : i32
    %10 = arith.select %9, %c1_i32, %c16_i32 : i32
    %11 = vector.broadcast %10 : i32 to vector<32x128xi32>
    %12 = arith.remsi %8, %11 : vector<32x128xi32>
    %c0_i32_8 = arith.constant 0 : i32
    %13 = vector.broadcast %c0_i32_8 : i32 to vector<32x128xi32>
    %14 = arith.cmpi ne, %12, %13 : vector<32x128xi32>
    %c0_i32_9 = arith.constant 0 : i32
    %15 = vector.broadcast %c0_i32_9 : i32 to vector<32x128xi32>
    %16 = arith.cmpi slt, %12, %15 : vector<32x128xi32>
    %c0_i32_10 = arith.constant 0 : i32
    %17 = arith.cmpi slt, %10, %c0_i32_10 : i32
    %18 = vector.broadcast %17 : i1 to vector<32x128xi1>
    %19 = vector.broadcast %18 : vector<32x128xi1> to vector<32x128xi1>
    %20 = arith.xori %16, %19 : vector<32x128xi1>
    %21 = arith.andi %20, %14 : vector<32x128xi1>
    %22 = vector.broadcast %10 : i32 to vector<32x128xi32>
    %23 = arith.addi %12, %22 : vector<32x128xi32>
    %24 = arith.select %21, %23, %12 : vector<32x128xi1>, vector<32x128xi32>
    %c8_i32 = arith.constant 8 : i32
    %25 = vector.broadcast %c8_i32 : i32 to vector<32x128xi32>
    %26 = arith.cmpi sge, %7, %25 : vector<32x128xi32>
    %c120_i32 = arith.constant 120 : i32
    %27 = vector.broadcast %c120_i32 : i32 to vector<32x128xi32>
    %28 = arith.cmpi slt, %7, %27 : vector<32x128xi32>
    %c1_i32_11 = arith.constant 1 : i32
    %29 = vector.broadcast %c1_i32_11 : i32 to vector<32x128xi32>
    %30 = arith.cmpi sge, %24, %29 : vector<32x128xi32>
    %c14_i32 = arith.constant 14 : i32
    %31 = vector.broadcast %c14_i32 : i32 to vector<32x128xi32>
    %32 = arith.cmpi sle, %24, %31 : vector<32x128xi32>
    %c8_i32_12 = arith.constant 8 : i32
    %c0_i32_13 = arith.constant 0 : i32
    %33 = arith.cmpi eq, %c8_i32_12, %c0_i32_13 : i32
    %c1_i32_14 = arith.constant 1 : i32
    %34 = arith.select %33, %c1_i32_14, %c8_i32_12 : i32
    %35 = vector.broadcast %34 : i32 to vector<32x128xi32>
    %36 = arith.remsi %7, %35 : vector<32x128xi32>
    %c0_i32_15 = arith.constant 0 : i32
    %37 = vector.broadcast %c0_i32_15 : i32 to vector<32x128xi32>
    %38 = arith.cmpi ne, %36, %37 : vector<32x128xi32>
    %c0_i32_16 = arith.constant 0 : i32
    %39 = vector.broadcast %c0_i32_16 : i32 to vector<32x128xi32>
    %40 = arith.cmpi slt, %36, %39 : vector<32x128xi32>
    %c0_i32_17 = arith.constant 0 : i32
    %41 = arith.cmpi slt, %34, %c0_i32_17 : i32
    %42 = vector.broadcast %41 : i1 to vector<32x128xi1>
    %43 = vector.broadcast %42 : vector<32x128xi1> to vector<32x128xi1>
    %44 = arith.xori %40, %43 : vector<32x128xi1>
    %45 = arith.andi %44, %38 : vector<32x128xi1>
    %46 = vector.broadcast %34 : i32 to vector<32x128xi32>
    %47 = arith.addi %36, %46 : vector<32x128xi32>
    %48 = arith.select %45, %47, %36 : vector<32x128xi1>, vector<32x128xi32>
    %c3_i32 = arith.constant 3 : i32
    %49 = vector.broadcast %c3_i32 : i32 to vector<32x128xi32>
    %50 = arith.cmpi eq, %48, %49 : vector<32x128xi32>
    %c0_18 = arith.constant 0 : index
    %c0_19 = arith.constant 0 : index
    %c0_20 = arith.constant 0 : index
    %51 = vector.load %arg0[%c0_18, %c0_19, %c0_20] : memref<2x16x128xf32, #tpu.memory_space<vmem>>, vector<2x16x128xf32>
    %52 = vector.shape_cast %51 : vector<2x16x128xf32> to vector<32x128xf32>
    %cst = arith.constant 0xFF800000 : f32
    %c0_i32_21 = arith.constant 0 : i32
    %53 = vector.shape_cast %52 : vector<32x128xf32> to vector<2x16x128xf32>
    %54 = vector.extract_strided_slice %53 {offsets = [0, 15, 0], sizes = [2, 1, 128], strides = [1, 1, 1]} : vector<2x16x128xf32> to vector<2x1x128xf32>
    %55 = vector.extract_strided_slice %53 {offsets = [0, 0, 0], sizes = [2, 15, 128], strides = [1, 1, 1]} : vector<2x16x128xf32> to vector<2x15x128xf32>
    %56 = tpu.concatenate %54, %55 in 1 : vector<2x1x128xf32>, vector<2x15x128xf32> -> vector<2x16x128xf32>
    %57 = vector.shape_cast %56 : vector<2x16x128xf32> to vector<32x128xf32>
    %58 = vector.shape_cast %52 : vector<32x128xf32> to vector<2x16x128xf32>
    %59 = vector.extract_strided_slice %58 {offsets = [0, 1, 0], sizes = [2, 15, 128], strides = [1, 1, 1]} : vector<2x16x128xf32> to vector<2x15x128xf32>
    %60 = vector.extract_strided_slice %58 {offsets = [0, 0, 0], sizes = [2, 1, 128], strides = [1, 1, 1]} : vector<2x16x128xf32> to vector<2x1x128xf32>
    %61 = tpu.concatenate %59, %60 in 1 : vector<2x15x128xf32>, vector<2x1x128xf32> -> vector<2x16x128xf32>
    %62 = vector.shape_cast %61 : vector<2x16x128xf32> to vector<32x128xf32>
    %cst_22 = arith.constant 2.000000e+00 : f32
    %63 = vector.broadcast %cst_22 : f32 to vector<32x128xf32>
    %64 = arith.mulf %63, %52 : vector<32x128xf32>
    %65 = arith.addf %57, %64 : vector<32x128xf32>
    %66 = arith.addf %65, %62 : vector<32x128xf32>
    %67 = arith.subf %62, %57 : vector<32x128xf32>
    %c8_i32_23 = arith.constant 8 : i32
    %68 = tpu.dynamic_rotate %66 by %c8_i32_23 dim 1 : vector<32x128xf32>, i32 -> vector<32x128xf32>
    %c120_i32_24 = arith.constant 120 : i32
    %69 = tpu.dynamic_rotate %66 by %c120_i32_24 dim 1 : vector<32x128xf32>, i32 -> vector<32x128xf32>
    %c8_i32_25 = arith.constant 8 : i32
    %70 = tpu.dynamic_rotate %67 by %c8_i32_25 dim 1 : vector<32x128xf32>, i32 -> vector<32x128xf32>
    %c120_i32_26 = arith.constant 120 : i32
    %71 = tpu.dynamic_rotate %67 by %c120_i32_26 dim 1 : vector<32x128xf32>, i32 -> vector<32x128xf32>
    %cst_27 = arith.constant 2.000000e+00 : f32
    %72 = vector.broadcast %cst_27 : f32 to vector<32x128xf32>
    %73 = arith.mulf %72, %66 : vector<32x128xf32>
    %74 = arith.addf %68, %73 : vector<32x128xf32>
    %75 = arith.addf %74, %69 : vector<32x128xf32>
    %cst_28 = arith.constant 1.600000e+01 : f32
    %76 = vector.broadcast %cst_28 : f32 to vector<32x128xf32>
    %77 = arith.mulf %76, %52 : vector<32x128xf32>
    %78 = arith.subf %75, %77 : vector<32x128xf32>
    %cst_29 = arith.constant 1.250000e-01 : f32
    %79 = vector.broadcast %cst_29 : f32 to vector<32x128xf32>
    %80 = arith.mulf %78, %79 : vector<32x128xf32>
    %81 = vector.broadcast %1 : vector<1x128xf32> to vector<32x128xf32>
    %82 = arith.addf %80, %81 : vector<32x128xf32>
    %83 = arith.subf %69, %68 : vector<32x128xf32>
    %cst_30 = arith.constant 1.250000e-01 : f32
    %84 = vector.broadcast %cst_30 : f32 to vector<32x128xf32>
    %85 = arith.mulf %83, %84 : vector<32x128xf32>
    %86 = vector.broadcast %3 : vector<1x128xf32> to vector<32x128xf32>
    %87 = arith.addf %85, %86 : vector<32x128xf32>
    %cst_31 = arith.constant 2.000000e+00 : f32
    %88 = vector.broadcast %cst_31 : f32 to vector<32x128xf32>
    %89 = arith.mulf %88, %67 : vector<32x128xf32>
    %90 = arith.addf %70, %89 : vector<32x128xf32>
    %91 = arith.addf %90, %71 : vector<32x128xf32>
    %cst_32 = arith.constant 1.250000e-01 : f32
    %92 = vector.broadcast %cst_32 : f32 to vector<32x128xf32>
    %93 = arith.mulf %91, %92 : vector<32x128xf32>
    %94 = vector.broadcast %5 : vector<1x128xf32> to vector<32x128xf32>
    %95 = arith.addf %93, %94 : vector<32x128xf32>
    %96 = math.absf %52 : vector<32x128xf32>
    %97 = math.absf %82 : vector<32x128xf32>
    %98 = math.absf %87 : vector<32x128xf32>
    %99 = math.absf %95 : vector<32x128xf32>
    %100 = tpu.concatenate %52, %82, %87, %95, %96, %97, %98, %99 in 1 : vector<32x128xf32>, vector<32x128xf32>, vector<32x128xf32>, vector<32x128xf32>, vector<32x128xf32>, vector<32x128xf32>, vector<32x128xf32>, vector<32x128xf32> -> vector<32x1024xf32>
    %101 = arith.truncf %100 : vector<32x1024xf32> to vector<32x1024xbf16>
    %c0_33 = arith.constant 0 : index
    %c0_34 = arith.constant 0 : index
    %102 = vector.load %arg2[%c0_33, %c0_34] : memref<1024x128xbf16, #tpu.memory_space<vmem>>, vector<1024x128xbf16>
    %cst_35 = arith.constant dense<0.000000e+00> : vector<32x128xf32>
    %103 = tpu.matmul %101, %102, %cst_35 {dimension_numbers = #tpu.dot_dimension_numbers<[1], [0], [0], [1], [0, 0, 1, 1], [], []>} : vector<32x1024xbf16>, vector<1024x128xbf16>, vector<32x128xf32> -> vector<32x128xf32>
    %104 = vector.broadcast %6 : vector<1x128xf32> to vector<32x128xf32>
    %105 = arith.addf %103, %104 : vector<32x128xf32>
    %c8_i32_36 = arith.constant 8 : i32
    %106 = tpu.dynamic_rotate %52 by %c8_i32_36 dim 1 : vector<32x128xf32>, i32 -> vector<32x128xf32>
    %107 = vector.broadcast %cst : f32 to vector<32x128xf32>
    %108 = arith.select %26, %106, %107 : vector<32x128xi1>, vector<32x128xf32>
    %c120_i32_37 = arith.constant 120 : i32
    %109 = tpu.dynamic_rotate %52 by %c120_i32_37 dim 1 : vector<32x128xf32>, i32 -> vector<32x128xf32>
    %110 = vector.broadcast %cst : f32 to vector<32x128xf32>
    %111 = arith.select %28, %109, %110 : vector<32x128xi1>, vector<32x128xf32>
    %112 = arith.maximumf %108, %52 : vector<32x128xf32>
    %113 = arith.maximumf %112, %111 : vector<32x128xf32>
    %114 = vector.shape_cast %113 : vector<32x128xf32> to vector<2x16x128xf32>
    %115 = vector.extract_strided_slice %114 {offsets = [0, 15, 0], sizes = [2, 1, 128], strides = [1, 1, 1]} : vector<2x16x128xf32> to vector<2x1x128xf32>
    %116 = vector.extract_strided_slice %114 {offsets = [0, 0, 0], sizes = [2, 15, 128], strides = [1, 1, 1]} : vector<2x16x128xf32> to vector<2x15x128xf32>
    %117 = tpu.concatenate %115, %116 in 1 : vector<2x1x128xf32>, vector<2x15x128xf32> -> vector<2x16x128xf32>
    %118 = vector.shape_cast %117 : vector<2x16x128xf32> to vector<32x128xf32>
    %119 = vector.broadcast %cst : f32 to vector<32x128xf32>
    %120 = arith.select %30, %118, %119 : vector<32x128xi1>, vector<32x128xf32>
    %121 = vector.shape_cast %113 : vector<32x128xf32> to vector<2x16x128xf32>
    %122 = vector.extract_strided_slice %121 {offsets = [0, 1, 0], sizes = [2, 15, 128], strides = [1, 1, 1]} : vector<2x16x128xf32> to vector<2x15x128xf32>
    %123 = vector.extract_strided_slice %121 {offsets = [0, 0, 0], sizes = [2, 1, 128], strides = [1, 1, 1]} : vector<2x16x128xf32> to vector<2x1x128xf32>
    %124 = tpu.concatenate %122, %123 in 1 : vector<2x15x128xf32>, vector<2x1x128xf32> -> vector<2x16x128xf32>
    %125 = vector.shape_cast %124 : vector<2x16x128xf32> to vector<32x128xf32>
    %126 = vector.broadcast %cst : f32 to vector<32x128xf32>
    %127 = arith.select %32, %125, %126 : vector<32x128xi1>, vector<32x128xf32>
    %128 = arith.maximumf %120, %113 : vector<32x128xf32>
    %129 = arith.maximumf %128, %127 : vector<32x128xf32>
    %130 = vector.broadcast %cst : f32 to vector<32x128xf32>
    %131 = arith.select %50, %129, %130 : vector<32x128xi1>, vector<32x128xf32>
    %c125_i32 = arith.constant 125 : i32
    %132 = tpu.dynamic_rotate %131 by %c125_i32 dim 1 : vector<32x128xf32>, i32 -> vector<32x128xf32>
    %c1_i32_38 = arith.constant 1 : i32
    %133 = tpu.dynamic_rotate %132 by %c1_i32_38 dim 1 : vector<32x128xf32>, i32 -> vector<32x128xf32>
    %134 = arith.maximumf %132, %133 : vector<32x128xf32>
    %c2_i32 = arith.constant 2 : i32
    %135 = tpu.dynamic_rotate %134 by %c2_i32 dim 1 : vector<32x128xf32>, i32 -> vector<32x128xf32>
    %136 = arith.maximumf %134, %135 : vector<32x128xf32>
    %c4_i32 = arith.constant 4 : i32
    %137 = tpu.dynamic_rotate %136 by %c4_i32 dim 1 : vector<32x128xf32>, i32 -> vector<32x128xf32>
    %138 = arith.maximumf %136, %137 : vector<32x128xf32>
    %cst_39 = arith.constant 1.000000e-01 : f32
    %139 = vector.broadcast %cst_39 : f32 to vector<32x128xf32>
    %140 = arith.cmpf ogt, %138, %139 : vector<32x128xf32>
    %141 = arith.index_cast %c0_i32_21 : i32 to index
    %c0_40 = arith.constant 0 : index
    %c0_41 = arith.constant 0 : index
    %142 = vector.load %arg4[%141, %c0_40, %c0_41] : memref<1x32x128xf32, #tpu.memory_space<vmem>>, vector<1x32x128xf32>
    %143 = vector.shape_cast %142 : vector<1x32x128xf32> to vector<32x128xf32>
    %144 = arith.mulf %105, %143 : vector<32x128xf32>
    %145 = arith.addf %52, %144 : vector<32x128xf32>
    %cst_42 = arith.constant 0.000000e+00 : f32
    %146 = vector.broadcast %cst_42 : f32 to vector<32x128xf32>
    %147 = arith.select %140, %145, %146 : vector<32x128xi1>, vector<32x128xf32>
    %c1_i32_43 = arith.constant 1 : i32
    %148 = vector.shape_cast %147 : vector<32x128xf32> to vector<2x16x128xf32>
    %c0_44 = arith.constant 0 : index
    %c0_45 = arith.constant 0 : index
    %c0_46 = arith.constant 0 : index
    %149 = vector.load %arg5[%c0_44, %c0_45, %c0_46] : memref<2x16x128xf32, #tpu.memory_space<vmem>>, vector<2x16x128xf32>
    tpu.vector_store %arg5[%c0_44, %c0_45, %c0_46], %148 {strides = array<i32>} : memref<2x16x128xf32, #tpu.memory_space<vmem>>, vector<2x16x128xf32>,
    return
  }
}

</mosaic_0001>

<bundles_post_ra>
// kernel: unca_forward.1
= control target key start
LH: loop header
LB: loop body
LE: loop exit
PB: predicated region body
PF: predicated region fallthrough
CT: control target
= control target key end

     0   :  { %vm116_vm0 = vcmask 1040384   ;;  %vm127_vm1 = vcmask 1046528   ;;  %s1448_s22 = smov 8   ;;  %s1449_s27 = smov 120   ;;  %s2013_s0 = inlined_call_operand.vmem [shape: f32[2,16,128], index: 0, kind: input, shape index: {}]   ;;  %s2014_s1 = inlined_call_operand.vmem [shape: f32[3,1,128], index: 1, kind: input, shape index: {}]   ;;  %s2015_s2 = inlined_call_operand.vmem [shape: bf16[1024,128], index: 2, kind: input, shape index: {}]   ;;  %s2016_s3 = inlined_call_operand.vmem [shape: f32[1,128], index: 3, kind: input, shape index: {}]   ;;  %s2017_s4 = inlined_call_operand.vmem [shape: f32[1,32,128], index: 4, kind: input, shape index: {}]   ;;  %s2018_s5 = inlined_call_operand.vmem [shape: f32[2,16,128], index: 5, kind: output, shape index: {}]  }
   0x1   :  { %v1487_v0 = vld [vmem:[%s2013_s0] sm:$0xff]  ;;  %v1492_v1 = vld [vmem:[%s2013_s0 + $0x8] sm:$0xff]  ;;  %v1512_v14 = vld [vmem:[%s2013_s0 + $0x10] sm:$0xff]  ;;  %s1453_s15 = smov 4  }
   0x2   :  { %v110_v2 = vrot.slane %v1492_v1, 7  ;;  %v117_v3 = vrot.slane %v1487_v0, 7  ;;  %v128_v4 = vrot.slane %v1487_v0, 1  ;;  %v129_v5 = vrot.slane %v1492_v1, 1  ;;  %v1517_v15 = vld [vmem:[%s2013_s0 + $0x18] sm:$0xff]  ;;  %v1378_v35 = vld [vmem:[%s2015_s2 + $0x30] sm:$0xff] }
   0x3   :  { %v142_v6 = vmul.f32 2.0, %v1487_v0  ;;  %v143_v10 = vmul.f32 2.0, %v1492_v1  ;;  %v111_v18 = vrot.slane %v1517_v15, 7  ;;  %v119_v19 = vrot.slane %v1512_v14, 7  ;;  %v1379_v34 = vld [vmem:[%s2015_s2 + $0x38] sm:$0xff]  ;;  %v1394_v41 = vld [vmem:[%s2015_s2 + $0xb0] sm:$0xff] }
   0x4   :  { %v125_v7 = vsel %vm116_vm0, %v110_v2, %v117_v3  ;;  %v130_v8 = vsel %vm127_vm1, %v128_v4, %v129_v5  ;;  %v118_v12 = vsel %vm116_vm0, %v117_v3, %v110_v2  ;;  %v140_v17 = vsel %vm127_vm1, %v129_v5, %v128_v4  ;;  %806 = vmatpush.bf16.msra.mxu0 %v1379_v34  ;;  %v1395_v36 = vld [vmem:[%s2015_s2 + $0xb8] sm:$0xff]  ;;  %v1386_v42 = vld [vmem:[%s2015_s2 + $0x70] sm:$0xff]  ;;  %v1377_v43 = vld [vmem:[%s2015_s2 + $0x28] sm:$0xff] }
   0x5   :  { %v146_v9 = vadd.f32 %v142_v6, %v125_v7  ;;  %v1502_v11 = vsub.f32 %v130_v8, %v125_v7  ;;  %v147_v16 = vadd.f32 %v143_v10, %v118_v12  ;;  %v1528_v21 = vsub.f32 %v140_v17, %v118_v12  ;;  %v1387_v37 = vld [vmem:[%s2015_s2 + $0x78] sm:$0xff]  ;;  %844 = vmatpush.bf16.msra.mxu2 %v1395_v36  ;;  %v1402_v44 = vld [vmem:[%s2015_s2 + $0xf0] sm:$0xff]  ;;  %v1393_v45 = vld [vmem:[%s2015_s2 + $0xa8] sm:$0xff] }
   0x6   :  { %v144_v22 = vmul.f32 2.0, %v1512_v14  ;;  %v126_v23 = vsel %vm116_vm0, %v111_v18, %v119_v19  ;;  %v131_v24 = vrot.slane %v1512_v14, 1  ;;  %v132_v25 = vrot.slane %v1517_v15, 1  ;;  %825 = vmatpush.bf16.msra.mxu1 %v1387_v37  ;;  %v1403_v40 = vld [vmem:[%s2015_s2 + $0xf8] sm:$0xff]  ;;  %v1385_v46 = vld [vmem:[%s2015_s2 + $0x68] sm:$0xff]  ;;  %v1376_v47 = vld [vmem:[%s2015_s2 + $0x20] sm:$0xff] }
   0x7   :  { %v1505_v13 = vadd.f32 %v146_v9, %v130_v8  ;;  %174 = vrot.lane.b32.xlu2 %v1502_v11, %s1448_s22  ;;  %v1526_v20 = vadd.f32 %v147_v16, %v140_v17  ;;  %v145_v29 = vmul.f32 2.0, %v1517_v15  ;;  %v120_v30 = vsel %vm116_vm0, %v119_v19, %v111_v18  ;;  %863 = vmatpush.bf16.msra.mxu3 %v1403_v40  ;;  %v1392_v48 = vld [vmem:[%s2015_s2 + $0xa0] sm:$0xff]  ;;  %v1375_v49 = vld [vmem:[%s2015_s2 + $0x18] sm:$0xff]  ;;  %v1374_v50 = vld [vmem:[%s2015_s2 + $0x10] sm:$0xff] }
   0x8   :  { %v148_v26 = vadd.f32 %v144_v22, %v126_v23  ;;  %v133_v27 = vsel %vm127_vm1, %v131_v24, %v132_v25  ;;  %v141_v32 = vsel %vm127_vm1, %v132_v25, %v131_v24  ;;  %807 = vmatpush.bf16.msra.mxu0 %v1378_v35  ;;  %v1373_v51 = vld [vmem:[%s2015_s2 + $0x8] sm:$0xff]  ;;  %v1372_v52 = vld [vmem:[%s2015_s2] sm:$0xff]  ;;  %v275_v53 = vpack.c.bf16 %v1492_v1, %v1487_v0  ;;  %v1391_v55 = vld [vmem:[%s2015_s2 + $0x98] sm:$0xff] }
   0x9   :  { %166 = vrot.lane.b32.xlu1 %v1505_v13, %s1449_s27  ;;  %158 = vrot.lane.b32.xlu0 %v1505_v13, %s1448_s22  ;;  %v149_v31 = vadd.f32 %v145_v29, %v120_v30  ;;  %v1572_v38 = vsub.f32 %v141_v32, %v120_v30  ;;  %v1574_v39 = vsub.f32 %v133_v27, %v126_v23  ;;  %v1384_v54 = vld [vmem:[%s2015_s2 + $0x60] sm:$0xff]  ;;  %v1401_v56 = vld [vmem:[%s2015_s2 + $0xe8] sm:$0xff]  ;;  %v259_v35 = vand.u32 2147483647, %v1487_v0 }
   0xa   :  { %v1541_v28 = vadd.f32 %v148_v26, %v133_v27  ;;  %845 = vmatpush.bf16.msra.mxu2 %v1394_v41  ;;  %826 = vmatpush.bf16.msra.mxu1 %v1386_v42  ;;  %v1411_v57 = vld [vmem:[%s2015_s2 + $0x138] sm:$0xff]  ;;  %v1390_v59 = vld [vmem:[%s2015_s2 + $0x90] sm:$0xff]  ;;  %v1400_v60 = vld [vmem:[%s2015_s2 + $0xe0] sm:$0xff]  ;;  %v283_v9 = vpack.c.bf16 %v1517_v15, %v1512_v14  ;;  %v260_v36 = vand.u32 2147483647, %v1492_v1 }
   0xb   :  { %v1552_v33 = vadd.f32 %v149_v31, %v141_v32  ;;  %864 = vmatpush.bf16.msra.mxu3 %v1402_v44  ;;  %v1383_v58 = vld [vmem:[%s2015_s2 + $0x58] sm:$0xff]  ;;  %v1410_v61 = vld [vmem:[%s2015_s2 + $0x130] sm:$0xff]  ;;  %v1389_v63 = vld [vmem:[%s2015_s2 + $0x88] sm:$0xff]  ;;  %v190_v32 = vmul.f32 2.0, %v1505_v13 }
   0xc   :  { %808 = vmatpush.bf16.msra.mxu0 %v1377_v43  ;;  %v1382_v62 = vld [vmem:[%s2015_s2 + $0x50] sm:$0xff]  ;;  %v1399_v2 = vld [vmem:[%s2015_s2 + $0xd8] sm:$0xff]  ;;  %v1409_v4 = vld [vmem:[%s2015_s2 + $0x128] sm:$0xff]  ;;  %v279_v37 = vpack.c.bf16 %v260_v36, %v259_v35 }
   0xd   :  { %v1381_v5 = vld [vmem:[%s2015_s2 + $0x48] sm:$0xff]  ;;  %v1388_v6 = vld [vmem:[%s2015_s2 + $0x80] sm:$0xff]  ;;  %v1398_v7 = vld [vmem:[%s2015_s2 + $0xd0] sm:$0xff] }
   0xe   :  { %846 = vmatpush.bf16.msra.mxu2 %v1393_v45  ;;  %827 = vmatpush.bf16.msra.mxu1 %v1385_v46  ;;  %v1408_v8 = vld [vmem:[%s2015_s2 + $0x120] sm:$0xff]  ;;  %v1397_v12 = vld [vmem:[%s2015_s2 + $0xc8] sm:$0xff]  ;;  %v1407_v16 = vld [vmem:[%s2015_s2 + $0x118] sm:$0xff] }
   0xf   :  { %176 = vrot.lane.b32.xlu2 %v1528_v21, %s1448_s22  ;;  %865 = vmatpush.bf16.msra.mxu3 %v1401_v56  ;;  %v1380_v10 = vld [vmem:[%s2015_s2 + $0x40] sm:$0xff]  ;;  %v1427_v17 = vld [vmem:[%s2015_s2 + $0x1b8] sm:$0xff]  ;;  %v1406_v22 = vld [vmem:[%s2015_s2 + $0x110] sm:$0xff] }
  0x10   :  { %809 = vmatpush.bf16.msra.mxu0 %v1376_v47  ;;  %v1396_v19 = vld [vmem:[%s2015_s2 + $0xc0] sm:$0xff]  ;;  %v1419_v23 = vld [vmem:[%s2015_s2 + $0x178] sm:$0xff]  ;;  %v1426_v24 = vld [vmem:[%s2015_s2 + $0x1b0] sm:$0xff] }
  0x11   :  { %168 = vrot.lane.b32.xlu1 %v1526_v20, %s1449_s27  ;;  %160 = vrot.lane.b32.xlu0 %v1526_v20, %s1448_s22  ;;  %v1405_v25 = vld [vmem:[%s2015_s2 + $0x108] sm:$0xff]  ;;  %v1418_v26 = vld [vmem:[%s2015_s2 + $0x170] sm:$0xff] }
  0x12   :  { %847 = vmatpush.bf16.msra.mxu2 %v1392_v48  ;;  %828 = vmatpush.bf16.msra.mxu1 %v1384_v54  ;;  %v1425_v27 = vld [vmem:[%s2015_s2 + $0x1a8] sm:$0xff]  ;;  %v1404_v29 = vld [vmem:[%s2015_s2 + $0x100] sm:$0xff]  ;;  %v1423_v13 = vld [vmem:[%s2015_s2 + $0x198] sm:$0xff]  ;;  %v202_v48 = vmul.f32 16.0, %v1487_v0 }
  0x13   :  { %866 = vmatpush.bf16.msra.mxu3 %v1400_v60  ;;  %v1417_v30 = vld [vmem:[%s2015_s2 + $0x168] sm:$0xff]  ;;  %v1424_v31 = vld [vmem:[%s2015_s2 + $0x1a0] sm:$0xff]  ;;  %v1435_v43 = vld [vmem:[%s2015_s2 + $0x1f8] sm:$0xff] }
  0x14   :  { %810 = vmatpush.bf16.msra.mxu0 %v1375_v49  ;;  %v1416_v42 = vld [vmem:[%s2015_s2 + $0x160] sm:$0xff]  ;;  %v1415_v45 = vld [vmem:[%s2015_s2 + $0x158] sm:$0xff]  ;;  %v1422_v46 = vld [vmem:[%s2015_s2 + $0x190] sm:$0xff] }
  0x15   :  { %v1434_v47 = vld [vmem:[%s2015_s2 + $0x1f0] sm:$0xff] }
  0x16   :  { %848 = vmatpush.bf16.msra.mxu2 %v1391_v55  ;;  %829 = vmatpush.bf16.msra.mxu1 %v1383_v58  ;;  %v203_v55 = vmul.f32 16.0, %v1492_v1  ;;  %v1421_v58 = vld [vmem:[%s2015_s2 + $0x188] sm:$0xff] }
  0x17   :  { %162 = vrot.lane.b32.xlu2 %v1541_v28, %s1448_s22  ;;  %867 = vmatpush.bf16.msra.mxu3 %v1399_v2 }
  0x18   :  { %811 = vmatpush.bf16.msra.mxu0 %v1374_v50 }
  0x19   :  { %184 = vrot.lane.b32.xlu1 %v1528_v21, %s1449_s27  ;;  %182 = vrot.lane.b32.xlu0 %v1502_v11, %s1449_s27 }
  0x1a   :  { %849 = vmatpush.bf16.msra.mxu2 %v1390_v59  ;;  %830 = vmatpush.bf16.msra.mxu1 %v1382_v62  ;;  %v1778_v62 = vld [vmem:[%s2014_s1 + $0x1] ss:$0 sm:$0xff] }
  0x1b   :  { %868 = vmatpush.bf16.msra.mxu3 %v1398_v7  ;;  %v1420_v7 = vld [vmem:[%s2015_s2 + $0x180] sm:$0xff] }
  0x1c   :  { %812 = vmatpush.bf16.msra.mxu0 %v1373_v51  ;;  %v191_v51 = vmul.f32 2.0, %v1526_v20  ;;  %v1433_v20 = vld [vmem:[%s2015_s2 + $0x1e8] sm:$0xff] }
  0x1e   :  { %850 = vmatpush.bf16.msra.mxu2 %v1389_v63  ;;  %831 = vmatpush.bf16.msra.mxu1 %v1381_v5  ;;  %v236_v63 = vmul.f32 2.0, %v1502_v11 }
  0x1f   :  { %172 = vrot.lane.b32.xlu2 %v1552_v33, %s1449_s27  ;;  %869 = vmatpush.bf16.msra.mxu3 %v1397_v12 }
  0x20   :  { %813 = vmatpush.bf16.msra.mxu0 %v1372_v52 }
  0x21   :  { %170 = vrot.lane.b32.xlu1 %v1541_v28, %s1449_s27  ;;  %164 = vrot.lane.b32.xlu0 %v1552_v33, %s1448_s22 }
  0x22   :  { %851 = vmatpush.bf16.msra.mxu2 %v1388_v6  ;;  %832 = vmatpush.bf16.msra.mxu1 %v1380_v10  ;;  %v1413_v6 = vld [vmem:[%s2015_s2 + $0x148] sm:$0xff] }
  0x23   :  { %814 = vmatmul.bf16.vlgmr.msra.gmra.mxu0 %v275_v53  ;;  %870 = vmatpush.bf16.msra.mxu3 %v1396_v19  ;;  %v237_v53 = vmul.f32 2.0, %v1528_v21 }
  0x24   :  { %882 = vmatpush.bf16.msrb.mxu0 %v1411_v57  ;;  %v1414_v57 = vld [vmem:[%s2015_s2 + $0x150] sm:$0xff] }
  0x26   :  { %920 = vmatpush.bf16.msrb.mxu2 %v1427_v17  ;;  %901 = vmatpush.bf16.msrb.mxu1 %v1419_v23 }
  0x27   :  { %186 = vrot.lane.b32.xlu2 %v1574_v39, %s1449_s27  ;;  %939 = vmatpush.bf16.msrb.mxu3 %v1435_v43  ;;  %v261_v43 = vand.u32 2147483647, %v1512_v14 }
  0x28   :  { %883 = vmatpush.bf16.msrb.mxu0 %v1410_v61 }
  0x29   :  { %180 = vrot.lane.b32.xlu1 %v1572_v38, %s1448_s22  ;;  %178 = vrot.lane.b32.xlu0 %v1574_v39, %s1448_s22 }
  0x2a   :  { %921 = vmatpush.bf16.msrb.mxu2 %v1426_v24  ;;  %902 = vmatpush.bf16.msrb.mxu1 %v1418_v26  ;;  %v1431_v26 = vld [vmem:[%s2015_s2 + $0x1d8] sm:$0xff] }
  0x2b   :  { %940 = vmatpush.bf16.msrb.mxu3 %v1434_v47 }
  0x2c   :  { %884 = vmatpush.bf16.msrb.mxu0 %v1409_v4 }
  0x2e   :  { %922 = vmatpush.bf16.msrb.mxu2 %v1425_v27  ;;  %903 = vmatpush.bf16.msrb.mxu1 %v1417_v30 }
  0x2f   :  { %960 = vrot.lane.b32.xlu2 %v1492_v1, %s1448_s22  ;;  %941 = vmatpush.bf16.msrb.mxu3 %v1433_v20 }
  0x30   :  { %885 = vmatpush.bf16.msrb.mxu0 %v1408_v8  ;;  %v1432_v8 = vld [vmem:[%s2015_s2 + $0x1e0] sm:$0xff] }
  0x31   :  { %958 = vrot.lane.b32.xlu1 %v1487_v0, %s1448_s22  ;;  %188 = vrot.lane.b32.xlu0 %v1572_v38, %s1449_s27 }
  0x32   :  { %923 = vmatpush.bf16.msrb.mxu2 %v1424_v31  ;;  %904 = vmatpush.bf16.msrb.mxu1 %v1416_v42 }
  0x33   :  { %819 = vmatmul.bf16.gmra.mxu0 %v283_v9  ;;  %942 = vmatpush.bf16.msrb.mxu3 %v1432_v8 }
  0x34   :  { %886 = vmatpush.bf16.msrb.mxu0 %v1407_v16  ;;  %v1800_v16 = vld [vmem:[%s2014_s1] ss:$0 sm:$0xff] }
  0x36   :  { %924 = vmatpush.bf16.msrb.mxu2 %v1423_v13  ;;  %905 = vmatpush.bf16.msrb.mxu1 %v1415_v45  ;;  %v193_v13 = vmul.f32 2.0, %v1552_v33  ;;  %v204_v45 = vmul.f32 16.0, %v1512_v14 }
  0x37   :  { %970 = vrot.lane.b32.xlu2 %v1487_v0, %s1449_s27  ;;  %943 = vmatpush.bf16.msrb.mxu3 %v1431_v26 }
  0x38   :  { %887 = vmatpush.bf16.msrb.mxu0 %v1406_v22  ;;  %v192_v22 = vmul.f32 2.0, %v1541_v28 }
  0x39   :  { %964 = vrot.lane.b32.xlu1 %v1517_v15, %s1448_s22  ;;  %962 = vrot.lane.b32.xlu0 %v1512_v14, %s1448_s22  ;;  %s1451_s22 = smov 1  }
  0x3a   :  { %925 = vmatpush.bf16.msrb.mxu2 %v1422_v46  ;;  %906 = vmatpush.bf16.msrb.mxu1 %v1414_v57 }
  0x3c   :  { %888 = vmatpush.bf16.msrb.mxu0 %v1405_v25  ;;  %v1412_v25 = vld [vmem:[%s2015_s2 + $0x140] sm:$0xff] }
  0x3e   :  { %926 = vmatpush.bf16.msrb.mxu2 %v1421_v58  ;;  %907 = vmatpush.bf16.msrb.mxu1 %v1413_v6 }
  0x3f   :  { %976 = vrot.lane.b32.xlu2 %v1517_v15, %s1449_s27 }
  0x40   :  { %889 = vmatpush.bf16.msrb.mxu0 %v1404_v29 }
  0x41   :  { %974 = vrot.lane.b32.xlu1 %v1512_v14, %s1449_s27  ;;  %972 = vrot.lane.b32.xlu0 %v1492_v1, %s1449_s27 }
  0x42   :  { %927 = vmatpush.bf16.msrb.mxu2 %v1420_v7  ;;  %908 = vmatpush.bf16.msrb.mxu1 %v1412_v25  ;;  %v239_v7 = vmul.f32 2.0, %v1572_v38 }
  0x43   :  { %890 = vmatmul.bf16.vlgmr.msrb.gmra.mxu0 %v279_v37 }
  0x61   :  { %v1674_v3 = vpop.permute.xlu2 %174 }
  0x62   :  { %v240_v17 = vadd.f32 %v236_v63, %v1674_v3  ;;  %v1815_v3 = vld [vmem:[%s2014_s1 + $0x2] ss:$0 sm:$0xff] }
  0x69   :  { %v1705_v18 = vpop.permute.xlu2 %176 }
  0x6a   :  { %v241_v5 = vadd.f32 %v237_v53, %v1705_v18 }
  0x71   :  { %v1738_v34 = vpop.permute.xlu2 %162 }
  0x72   :  { %v196_v37 = vadd.f32 %v192_v22, %v1738_v34 }
  0x79   :  { %v1762_v52 = vpop.permute.xlu2 %172 }
  0x7b   :  { %v167_v40 = vpop.permute.xlu1 %166  ;;  %v159_v41 = vpop.permute.xlu0 %158 }
  0x7c   :  { %v194_v44 = vadd.f32 %v190_v32, %v159_v41  ;;  %v221_v50 = vsub.f32 %v167_v40, %v159_v41 }
  0x7e   :  { %v198_v49 = vadd.f32 %v194_v44, %v167_v40  ;;  %v225_v60 = vmul.f32 0.125, %v221_v50  ;;  %v1430_v40 = vld [vmem:[%s2015_s2 + $0x1d0] sm:$0xff]  ;;  %v262_v44 = vand.u32 2147483647, %v1517_v15 }
  0x7f   :  { %944 = vmatpush.bf16.msrb.mxu3 %v1430_v40 }
  0x80   :  { %v206_v59 = vsub.f32 %v198_v49, %v202_v48  ;;  %v1792_v11 = vadd.f32 %v1778_v62, %v225_v60  ;;  %v205_v48 = vmul.f32 16.0, %v1517_v15  ;;  %v287_v50 = vpack.c.bf16 %v262_v44, %v261_v43 }
  0x81   :  { %v187_v31 = vpop.permute.xlu2 %186  ;;  %v238_v60 = vmul.f32 2.0, %v1574_v39 }
  0x82   :  { %v210_v12 = vmul.f32 0.125, %v206_v59  ;;  %895 = vmatmul.bf16.gmra.mxu0 %v287_v50 }
  0x83   :  { %v169_v54 = vpop.permute.xlu1 %168  ;;  %v161_v56 = vpop.permute.xlu0 %160 }
  0x84   :  { %v195_v21 = vadd.f32 %v191_v51, %v161_v56  ;;  %v222_v61 = vsub.f32 %v169_v54, %v161_v56  ;;  %v1818_v28 = vadd.f32 %v1800_v16, %v210_v12  ;;  %v1429_v51 = vld [vmem:[%s2015_s2 + $0x1c8] sm:$0xff] }
  0x85   :  { %945 = vmatpush.bf16.msrb.mxu3 %v1429_v51 }
  0x86   :  { %v199_v2 = vadd.f32 %v195_v21, %v169_v54  ;;  %v226_v4 = vmul.f32 0.125, %v222_v61  ;;  %v1428_v21 = vld [vmem:[%s2015_s2 + $0x1c0] sm:$0xff]  ;;  %v263_v43 = vand.u32 2147483647, %v1818_v28  ;;  %s1450_s2 = smov 125  }
  0x88   :  { %v207_v9 = vsub.f32 %v199_v2, %v203_v55  ;;  %v1795_v10 = vadd.f32 %v1778_v62, %v226_v4 }
  0x89   :  { %v961_v59 = vpop.permute.xlu2 %960  ;;  %946 = vmatpush.bf16.msrb.mxu3 %v1428_v21 }
  0x8a   :  { %v277_v18 = vpack.c.bf16 %v1795_v10, %v1792_v11  ;;  %v211_v19 = vmul.f32 0.125, %v207_v9  ;;  %v268_v38 = vand.u32 2147483647, %v1795_v10 }
  0x8b   :  { %v185_v23 = vpop.permute.xlu1 %184  ;;  %v183_v24 = vpop.permute.xlu0 %182 }
  0x8c   :  { %v245_v27 = vadd.f32 %v241_v5, %v185_v23  ;;  %v244_v29 = vadd.f32 %v240_v17, %v183_v24  ;;  %852 = vmatmul.bf16.vlgmr.msra.gmra.mxu2 %v277_v18  ;;  %v1821_v30 = vadd.f32 %v1800_v16, %v211_v19  ;;  %v26_v18 = vlaneseq }
  0x8e   :  { %v249_v32 = vmul.f32 0.125, %v245_v27  ;;  %v248_v35 = vmul.f32 0.125, %v244_v29  ;;  %v276_v36 = vpack.c.bf16 %v1821_v30, %v1818_v28  ;;  %v1869_v25 = vand.u32 127, %v26_v18 }
  0x90   :  { %v1830_v41 = vadd.f32 %v1815_v3, %v249_v32  ;;  %v1833_v42 = vadd.f32 %v1815_v3, %v248_v35  ;;  %833 = vmatmul.bf16.vlgmr.msra.gmra.mxu1 %v276_v36  ;;  %vm81_vm2 = vcmp.ge.s32.totalorder %v1869_v25, 8  ;;  %v29_v32 = vshrl.u32 %v26_v18, 7 }
  0x91   :  { %v971_v19 = vpop.permute.xlu2 %970  ;;  %v264_v35 = vand.u32 2147483647, %v1821_v30  ;;  %vm82_vm3 = vcmp.lt.s32.totalorder %v1869_v25, 120  ;;  %v967_v51 = vsel %vm81_vm2, %v961_v59, -inf }
  0x92   :  { %v278_v46 = vpack.c.bf16 %v1830_v41, %v1833_v42  ;;  %v30_v44 = vadd.s32 8, %v29_v32  ;;  %v271_v28 = vand.u32 2147483647, %v1833_v42  ;;  %v978_v50 = vsel %vm82_vm3, %v971_v19, -inf }
  0x93   :  { %v171_v47 = vpop.permute.xlu1 %170  ;;  %v165_v49 = vpop.permute.xlu0 %164 }
  0x94   :  { %v200_v33 = vadd.f32 %v196_v37, %v171_v47  ;;  %v223_v53 = vsub.f32 %v171_v47, %v1738_v34  ;;  %v197_v54 = vadd.f32 %v193_v13, %v165_v49  ;;  %v224_v55 = vsub.f32 %v1762_v52, %v165_v49  ;;  %871 = vmatmul.bf16.vlgmr.msra.gmra.mxu3 %v278_v46 }
  0x95   :  { %v280_v46 = vpack.c.bf16 %v264_v35, %v263_v43  ;;  %v272_v49 = vand.u32 2147483647, %v1830_v41 }
  0x96   :  { %v208_v56 = vsub.f32 %v200_v33, %v204_v45  ;;  %v227_v57 = vmul.f32 0.125, %v223_v53  ;;  %v201_v58 = vadd.f32 %v197_v54, %v1762_v52  ;;  %v228_v20 = vmul.f32 0.125, %v224_v55 }
  0x97   :  { %v44_v54 = vand.u32 15, %v30_v44 }
  0x98   :  { %v212_v61 = vmul.f32 0.125, %v208_v56  ;;  %v209_v34 = vsub.f32 %v201_v58, %v205_v48  ;;  %v1853_v63 = vadd.f32 %v1778_v62, %v227_v57  ;;  %v1856_v2 = vadd.f32 %v1778_v62, %v228_v20 }
  0x99   :  { %v977_v40 = vpop.permute.xlu2 %976  ;;  %v31_v48 = vadd.s32 16, %v29_v32  ;;  %v983_v57 = vmax.f32 %v967_v51, %v1492_v1  ;;  %vm1912_vm4 = vcmp.le.s32.totalorder %v44_v54, 14 }
  0x9a   :  { %v285_v52 = vpack.c.bf16 %v1856_v2, %v1853_v63  ;;  %v213_v4 = vmul.f32 0.125, %v209_v34  ;;  %v1861_v5 = vadd.f32 %v1800_v16, %v212_v61  ;;  %v981_v47 = vsel %vm82_vm3, %v977_v40, -inf }
  0x9b   :  { %v181_v39 = vpop.permute.xlu1 %180  ;;  %v179_v6 = vpop.permute.xlu0 %178  ;;  %v269_v56 = vand.u32 2147483647, %v1853_v63  ;;  %v270_v41 = vand.u32 2147483647, %v1856_v2  ;;  %v51_v42 = vand.u32 15, %v31_v48  ;;  %v37_v34 = vand.u32 15, %v29_v32 }
  0x9c   :  { %v242_v8 = vadd.f32 %v238_v60, %v179_v6  ;;  %857 = vmatmul.bf16.gmra.mxu2 %v285_v52  ;;  %v1865_v9 = vadd.f32 %v1800_v16, %v213_v4  ;;  %v243_v12 = vadd.f32 %v239_v7, %v181_v39  ;;  %v267_v16 = vand.u32 2147483647, %v1792_v11 }
  0x9d   :  { %v282_v60 = vpack.c.bf16 %v272_v49, %v271_v28  ;;  %v289_v6 = vpack.c.bf16 %v270_v41, %v269_v56  ;;  %v95_v7 = vand.u32 7, %v1869_v25  ;;  %vm1917_vm5 = vcmp.ge.s32.totalorder %v51_v42, 1 }
  0x9e   :  { %v284_v62 = vpack.c.bf16 %v1865_v9, %v1861_v5  ;;  %v246_v17 = vadd.f32 %v242_v8, %v187_v31  ;;  %v281_v37 = vpack.c.bf16 %v268_v38, %v267_v16  ;;  %vm1922_vm6 = vcmp.ge.s32.totalorder %v37_v34, 1 }
  0x9f   :  { %vm1936_vm7 = vcmp.eq.s32.totalorder %v95_v7, 3 }
  0xa0   :  { %838 = vmatmul.bf16.gmra.mxu1 %v284_v62  ;;  %v250_v24 = vmul.f32 0.125, %v246_v17  ;;  %v815_v56 = vpop.f32.mrf.mxu0 }
  0xa2   :  { %v1878_v31 = vadd.f32 %v1815_v3, %v250_v24  ;;  %v265_v24 = vand.u32 2147483647, %v1861_v5 }
  0xa3   :  { %v959_v22 = vpop.permute.xlu1 %958  ;;  %v189_v23 = vpop.permute.xlu0 %188 }
  0xa4   :  { %v247_v26 = vadd.f32 %v243_v12, %v189_v23  ;;  %v966_v10 = vsel %vm81_vm2, %v959_v22, -inf }
  0xa5   :  { %v982_v45 = vmax.f32 %v966_v10, %v1487_v0  ;;  %v32_v0 = vadd.s32 24, %v29_v32 }
  0xa6   :  { %v251_v27 = vmul.f32 0.125, %v247_v26 }
  0xa7   :  { %v986_v55 = vmax.f32 %v982_v45, %v978_v50  ;;  %v58_v52 = vand.u32 15, %v32_v0  ;;  %v273_v0 = vand.u32 2147483647, %v1878_v31 }
  0xa8   :  { %v1875_v29 = vadd.f32 %v1815_v3, %v251_v27  ;;  %v266_v27 = vand.u32 2147483647, %v1865_v9 }
  0xa9   :  { %v998_v1 = vrot.slane %v986_v55, 7  ;;  %v1012_v62 = vrot.slane %v986_v55, 1  ;;  %vm90_vm8 = vcmp.le.s32.totalorder %v58_v52, 14 }
  0xaa   :  { %v286_v36 = vpack.c.bf16 %v1875_v29, %v1878_v31  ;;  %v288_v45 = vpack.c.bf16 %v266_v27, %v265_v24  ;;  %v274_v51 = vand.u32 2147483647, %v1875_v29 }
  0xab   :  { %v965_v11 = vpop.permute.xlu1 %964  ;;  %v963_v13 = vpop.permute.xlu0 %962 }
  0xac   :  { %v969_v3 = vsel %vm81_vm2, %v965_v11, -inf  ;;  %876 = vmatmul.bf16.gmra.mxu3 %v286_v36  ;;  %928 = vmatmul.bf16.vlgmr.msrb.gmra.mxu2 %v281_v37  ;;  %v968_v33 = vsel %vm81_vm2, %v963_v13, -inf  ;;  %v290_v54 = vpack.c.bf16 %v274_v51, %v273_v0 }
  0xad   :  { %v985_v30 = vmax.f32 %v969_v3, %v1517_v15  ;;  %v984_v58 = vmax.f32 %v968_v33, %v1512_v14 }
  0xaf   :  { %v1901_v53 = vmax.f32 %v985_v30, %v981_v47 }
  0xb0   :  { %909 = vmatmul.bf16.vlgmr.msrb.gmra.mxu1 %v280_v46 }
  0xb1   :  { %v993_v63 = vrot.slane %v1901_v53, 7  ;;  %v1016_v19 = vrot.slane %v1901_v53, 1 }
  0xb3   :  { %v975_v20 = vpop.permute.xlu1 %974  ;;  %v973_v59 = vpop.permute.xlu0 %972 }
  0xb4   :  { %v980_v21 = vsel %vm82_vm3, %v975_v20, -inf  ;;  %v979_v61 = vsel %vm82_vm3, %v973_v59, -inf }
  0xb5   :  { %v988_v4 = vmax.f32 %v984_v58, %v980_v21  ;;  %v987_v2 = vmax.f32 %v983_v57, %v979_v61 }
  0xb7   :  { %v1000_v12 = vrot.slane %v988_v4, 7  ;;  %v992_v17 = vrot.slane %v987_v2, 7  ;;  %v1013_v18 = vrot.slane %v987_v2, 1  ;;  %v1015_v22 = vrot.slane %v988_v4, 1 }
  0xb9   :  { %v999_v26 = vsel %vm116_vm0, %v998_v1, %v992_v17  ;;  %v1024_v25 = vsel %vm127_vm1, %v1013_v18, %v1012_v62  ;;  %v1007_v38 = vsel %vm116_vm0, %v993_v63, %v1000_v12  ;;  %v1006_v36 = vsel %vm116_vm0, %v992_v17, %v998_v1 }
  0xba   :  { %v1027_v16 = vsel %vm1912_vm4, %v1024_v25, -inf  ;;  %v1031_v32 = vmax.f32 %v999_v26, %v987_v2  ;;  %v1010_v35 = vsel %vm1917_vm5, %v1007_v38, -inf  ;;  %v1008_v40 = vsel %vm1922_vm6, %v1006_v36, -inf }
  0xbb   :  { %v1032_v5 = vmax.f32 %v1010_v35, %v988_v4  ;;  %v1017_v10 = vsel %vm127_vm1, %v1015_v22, %v1016_v19  ;;  %v1030_v11 = vmax.f32 %v1008_v40, %v986_v55  ;;  %v1014_v43 = vsel %vm127_vm1, %v1012_v62, %v1013_v18  ;;  %v1960_v55 = vld [vmem:[%s2016_s3] ss:$0 sm:$0xff]  ;;  %s1452_s3 = smov 2  }
  0xbc   :  { %933 = vmatmul.bf16.gmra.mxu2 %v289_v6  ;;  %947 = vmatmul.bf16.vlgmr.msrb.gmra.mxu3 %v282_v60  ;;  %v1035_v9 = vmax.f32 %v1031_v32, %v1027_v16  ;;  %v1001_v3 = vsel %vm116_vm0, %v1000_v12, %v993_v63  ;;  %v1025_v46 = vsel %vm127_vm1, %v1016_v19, %v1015_v22  ;;  %v817_v22 = vpop.f32.mrf.mxu0 }
  0xbd   :  { %v1036_v13 = vmax.f32 %v1032_v5, %v1017_v10  ;;  %v1034_v44 = vmax.f32 %v1030_v11, %v1014_v43  ;;  %v1033_v49 = vmax.f32 %v1001_v3, %v1901_v53  ;;  %v1029_v28 = vsel %vm90_vm8, %v1025_v46, -inf }
  0xbe   :  { %v1039_v30 = vsel %vm1936_vm7, %v1035_v9, -inf  ;;  %v816_v53 = vadd.f32 %v1960_v55, %v815_v56  ;;  %v1092_v56 = vld [vmem:[%s2017_s4 + $0x10] sm:$0xff] }
  0xbf   :  { %1044 = vrot.lane.b32.xlu1 %v1039_v30, %s1450_s2  ;;  %v1040_v47 = vsel %vm1936_vm7, %v1036_v13, -inf  ;;  %v1038_v48 = vsel %vm1936_vm7, %v1034_v44, -inf  ;;  %v1037_v50 = vmax.f32 %v1033_v49, %v1029_v28 }
  0xc0   :  { %1046 = vrot.lane.b32.xlu2 %v1040_v47, %s1450_s2  ;;  %914 = vmatmul.bf16.gmra.mxu1 %v288_v45 }
  0xc1   :  { %1042 = vrot.lane.b32.xlu0 %v1038_v48, %s1450_s2  ;;  %v1041_v33 = vsel %vm1936_vm7, %v1037_v50, -inf }
  0xc4   :  { %v820_v25 = vpop.f32.mrf.mxu0 }
  0xc5   :  { %v821_v11 = vadd.f32 %v1960_v55, %v820_v25 }
  0xc9   :  { %1048 = vrot.lane.b32.xlu0 %v1041_v33, %s1450_s2 }
  0xcc   :  { %952 = vmatmul.bf16.gmra.mxu3 %v290_v54  ;;  %v822_v32 = vpop.f32.mrf.mxu0  ;;  %v818_v54 = vadd.f32 %v1960_v55, %v817_v22 }
  0xd4   :  { %v891_v5 = vpop.f32.mrf.mxu0 }
  0xdc   :  { %v893_v13 = vpop.f32.mrf.mxu0 }
  0xff   :  { %v896_v47 = vpop.f32.mrf.mxu0 }
 0x10d   :  { %v834_v41 = vpop.f32.mrf.mxu1 }
 0x10e   :  { %v835_v42 = vadd.f32 %v834_v41, %v816_v53 }
 0x10f   :  { %v853_v57 = vpop.f32.mrf.mxu2 }
 0x110   :  { %v854_v29 = vadd.f32 %v853_v57, %v835_v42 }
 0x115   :  { %v836_v23 = vpop.f32.mrf.mxu1 }
 0x116   :  { %v837_v41 = vadd.f32 %v836_v23, %v818_v54 }
 0x117   :  { %v872_v58 = vpop.f32.mrf.mxu3  ;;  %v855_v24 = vpop.f32.mrf.mxu2 }
 0x118   :  { %v1963_v20 = vadd.f32 %v872_v58, %v854_v29  ;;  %v856_v58 = vadd.f32 %v855_v24, %v837_v41 }
 0x11a   :  { %v1047_v59 = vpop.permute.xlu2 %1046 }
 0x11b   :  { %1054 = vrot.lane.b32.xlu0 %v1047_v59, %s1451_s22 }
 0x11d   :  { %v839_v38 = vpop.f32.mrf.mxu1 }
 0x11e   :  { %v840_v3 = vadd.f32 %v839_v38, %v821_v11 }
 0x11f   :  { %v874_v26 = vpop.f32.mrf.mxu3  ;;  %v858_v27 = vpop.f32.mrf.mxu2 }
 0x120   :  { %v859_v44 = vadd.f32 %v858_v27, %v840_v3 }
 0x125   :  { %v841_v35 = vpop.f32.mrf.mxu1 }
 0x127   :  { %v860_v36 = vpop.f32.mrf.mxu2 }
 0x12d   :  { %v910_v40 = vpop.f32.mrf.mxu1 }
 0x12f   :  { %v877_v16 = vpop.f32.mrf.mxu3  ;;  %v929_v9 = vpop.f32.mrf.mxu2 }
 0x130   :  { %v878_v46 = vadd.f32 %v877_v16, %v859_v44  ;;  %v1446_v16 = vld [vmem:[%s2013_s0 + $0x8] sm:$0xff] }
 0x131   :  { %v1045_v31 = vpop.permute.xlu1 %1044 }
 0x132   :  { %1052 = vrot.lane.b32.xlu2 %v1045_v31, %s1451_s22  ;;  %v897_v49 = vadd.f32 %v896_v47, %v878_v46 }
 0x133   :  { %v1043_v60 = vpop.permute.xlu0 %1042 }
 0x134   :  { %1050 = vrot.lane.b32.xlu1 %v1043_v60, %s1451_s22 }
 0x135   :  { %v912_v43 = vpop.f32.mrf.mxu1 }
 0x137   :  { %v879_v37 = vpop.f32.mrf.mxu3  ;;  %v931_v30 = vpop.f32.mrf.mxu2 }
 0x13b   :  { %v1049_v21 = vpop.permute.xlu0 %1048 }
 0x13c   :  { %1056 = vrot.lane.b32.xlu1 %v1049_v21, %s1451_s22 }
 0x13d   :  { %v915_v48 = vpop.f32.mrf.mxu1 }
 0x13e   :  { %v916_v28 = vadd.f32 %v915_v48, %v897_v49 }
 0x13f   :  { %v948_v10 = vpop.f32.mrf.mxu3  ;;  %v934_v50 = vpop.f32.mrf.mxu2 }
 0x140   :  { %v935_v33 = vadd.f32 %v934_v50, %v916_v28 }
 0x147   :  { %v950_v45 = vpop.f32.mrf.mxu3  ;;  %v936_v23 = vpop.f32.mrf.mxu2 }
 0x14f   :  { %v953_v51 = vpop.f32.mrf.mxu3 }
 0x150   :  { %v954_v0 = vadd.f32 %v953_v51, %v935_v33 }
 0x152   :  { %v1096_v53 = vmul.f32 %v1092_v56, %v954_v0 }
 0x154   :  { %v1100_v29 = vadd.f32 %v1096_v53, %v1512_v14  ;;  %v898_v14 = vpop.f32.mrf.mxu0 }
 0x157   :  { %v955_v25 = vpop.f32.mrf.mxu3 }
 0x18c   :  { %v1053_v61 = vpop.permute.xlu2 %1052 }
 0x18d   :  { %v1059_v34 = vmax.f32 %v1045_v31, %v1053_v61  ;;  %v1055_v52 = vpop.permute.xlu0 %1054  ;;  %v823_v31 = vadd.f32 %v1960_v55, %v822_v32  ;;  %v1091_v55 = vld [vmem:[%s2017_s4 + $0x8] sm:$0xff] }
 0x18e   :  { %v1060_v63 = vmax.f32 %v1047_v59, %v1055_v52 }
 0x18f   :  { %1064 = vrot.lane.b32.xlu0 %v1059_v34, %s1452_s3  ;;  %v842_v61 = vadd.f32 %v841_v35, %v823_v31 }
 0x190   :  { %1066 = vrot.lane.b32.xlu1 %v1060_v63, %s1452_s3 }
 0x1a6   :  { %v1051_v4 = vpop.permute.xlu1 %1050 }
 0x1a7   :  { %v1058_v2 = vmax.f32 %v1043_v60, %v1051_v4  ;;  %v875_v60 = vadd.f32 %v874_v26, %v856_v58 }
 0x1a9   :  { %1062 = vrot.lane.b32.xlu2 %v1058_v2, %s1452_s3 }
 0x1ae   :  { %v1057_v39 = vpop.permute.xlu1 %1056 }
 0x1af   :  { %v1061_v1 = vmax.f32 %v1049_v21, %v1057_v39  ;;  %v894_v21 = vadd.f32 %v893_v13, %v875_v60 }
 0x1b1   :  { %1068 = vrot.lane.b32.xlu2 %v1061_v1, %s1452_s3  ;;  %v913_v52 = vadd.f32 %v912_v43, %v894_v21 }
 0x1b3   :  { %v932_v39 = vadd.f32 %v931_v30, %v913_v52 }
 0x201   :  { %v1065_v6 = vpop.permute.xlu0 %1064 }
 0x202   :  { %v1965_v7 = vmax.f32 %v1059_v34, %v1065_v6  ;;  %v1067_v8 = vpop.permute.xlu1 %1066  ;;  %v892_v34 = vadd.f32 %v891_v5, %v1963_v20  ;;  %v951_v6 = vadd.f32 %v950_v45, %v932_v39 }
 0x203   :  { %v1072_v62 = vmax.f32 %v1060_v63, %v1067_v8  ;;  %v1063_v12 = vpop.permute.xlu2 %1062  ;;  %v861_v63 = vadd.f32 %v860_v36, %v842_v61  ;;  %v917_v8 = vpop.f32.mrf.mxu1 }
 0x204   :  { %v1967_v17 = vmax.f32 %v1058_v2, %v1063_v12  ;;  %1076 = vrot.lane.b32.xlu1 %v1965_v7, %s1453_s15  ;;  %v911_v4 = vadd.f32 %v910_v40, %v892_v34  ;;  %v1095_v22 = vmul.f32 %v1091_v55, %v951_v6  ;;  %v1447_v40 = vld [vmem:[%s2013_s0] sm:$0xff] }
 0x205   :  { %1078 = vrot.lane.b32.xlu2 %v1072_v62, %s1453_s15  ;;  %v880_v2 = vadd.f32 %v879_v37, %v861_v63 }
 0x206   :  { %1074 = vrot.lane.b32.xlu0 %v1967_v17, %s1453_s15  ;;  %v1099_v32 = vadd.f32 %v1446_v16, %v1095_v22 }
 0x20b   :  { %v1069_v18 = vpop.permute.xlu2 %1068 }
 0x20c   :  { %v1971_v19 = vmax.f32 %v1061_v1, %v1069_v18  ;;  %v930_v1 = vadd.f32 %v929_v9, %v911_v4  ;;  %v1090_v18 = vld [vmem:[%s2017_s4] sm:$0xff] }
 0x20e   :  { %1080 = vrot.lane.b32.xlu0 %v1971_v19, %s1453_s15  ;;  %v949_v12 = vadd.f32 %v948_v10, %v930_v1 }
 0x210   :  { %v1094_v24 = vmul.f32 %v1090_v18, %v949_v12 }
 0x212   :  { %v1098_v9 = vadd.f32 %v1447_v40, %v1094_v24 }
 0x25f   :  { %v1079_v42 = vpop.permute.xlu2 %1078 }
 0x260   :  { %v1084_v57 = vmax.f32 %v1072_v62, %v1079_v42  ;;  %v899_v62 = vadd.f32 %v898_v14, %v880_v2 }
 0x262   :  { %vm1088_vm9 = vcmp.gt.f32.partialorder %v1084_v57, 0.1  ;;  %v918_v20 = vadd.f32 %v917_v8, %v899_v62 }
 0x263   :  { %v1104_v59 = vsel %vm1088_vm9, %v1100_v29, 0.0 }
 0x264   :  { %1108 = vst [vmem:[%s2018_s5 + $0x10] sm:$0xff] %v1104_v59  ;;  %v937_v27 = vadd.f32 %v936_v23, %v918_v20 }
 0x266   :  { %v956_v37 = vadd.f32 %v955_v25, %v937_v27 }
 0x276   :  { %v1077_v26 = vpop.permute.xlu1 %1076 }
 0x277   :  { %v1083_v38 = vmax.f32 %v1965_v7, %v1077_v26  ;;  %v1093_v7 = vld [vmem:[%s2017_s4 + $0x18] sm:$0xff] }
 0x278   :  { %v1075_v35 = vpop.permute.xlu0 %1074 }
 0x279   :  { %vm1087_vm10 = vcmp.gt.f32.partialorder %v1083_v38, 0.1  ;;  %v1082_v36 = vmax.f32 %v1967_v17, %v1075_v35  ;;  %v1097_v17 = vmul.f32 %v1093_v7, %v956_v37 }
 0x27a   :  { %v1103_v5 = vsel %vm1087_vm10, %v1099_v32, 0.0 }
 0x27b   :  { %1107 = vst [vmem:[%s2018_s5 + $0x8] sm:$0xff] %v1103_v5  ;;  %vm1086_vm11 = vcmp.gt.f32.partialorder %v1082_v36, 0.1  ;;  %v1101_v43 = vadd.f32 %v1097_v17, %v1517_v15 }
 0x27c   :  { %v1102_v10 = vsel %vm1086_vm11, %v1098_v9, 0.0 }
 0x27d   :  { %1106 = vst [vmem:[%s2018_s5] sm:$0xff] %v1102_v10 }
 0x280   :  { %v1081_v11 = vpop.permute.xlu0 %1080 }
 0x281   :  { %v1085_v13 = vmax.f32 %v1971_v19, %v1081_v11 }
 0x283   :  { %vm1089_vm12 = vcmp.gt.f32.partialorder %v1085_v13, 0.1 }
 0x284   :  { %v1105_v3 = vsel %vm1089_vm12, %v1101_v43, 0.0 }
 0x285   :  { %1109 = vst [vmem:[%s2018_s5 + $0x18] sm:$0xff] %v1105_v3 }

</bundles_post_ra>
